<compile_context>
chip_gen: v5e
topology: v5e:2x2
jax: 0.10.0
libtpu: 0.0.40
codegen_flags: <defaults>
</compile_context>

<pallas_src>
import functools

import jax
import jax.numpy as jnp
from jax.experimental import pallas as pl
from jax.experimental.pallas import tpu as pltpu


def _round_up(n, m):
    return (n + m - 1) // m * m


def _pick_block_b(batch):
    """Pick the batch-row tile.

    This kernel is HBM-bandwidth / per-step-overhead bound (arithmetic
    intensity ~85 FLOP/byte << the MXU roofline crossover), so the tile is
    chosen to amortize the ~0.35us fixed grid-step overhead, not to "fill" the
    MXU.  Large batches get 1K-4K row tiles (still only a few MiB of VMEM even
    double-buffered); the grid keeps >=2 steps when the batch allows so the
    v7x megacore split has work for both TensorCores.  Small batches collapse
    to a single 16-row-aligned tile (16 sublanes = one packed bf16 vreg tile).
    """
    if batch >= 2048:
        return min(4096, _round_up(batch // 2, 256))
    if batch >= 512:
        return _round_up(batch // 2, 256)
    return max(16, _round_up(batch, 16))


def _mlp_kernel(x_ref, w1_ref, b1_ref, w2_ref, b2_ref, o_ref):
    # In-kernel cast of the x tile to the compute/weight dtype (no-op for f32
    # compute).  Doing this here instead of the wrapper avoids an extra HBM
    # read+write pass over x; the VPU cast hides under the tile DMA.
    x = x_ref[...].astype(w1_ref.dtype)
    # Layer 1 on the MXU with f32 accumulation; bias add + ReLU stay in f32
    # (keeps the v5e VPU, which has no bf16 datapath, on the cheap path).
    h = jnp.dot(x, w1_ref[...], preferred_element_type=jnp.float32)
    h = jnp.maximum(h + b1_ref[...], 0.0)          # (1,128) bias row-broadcasts free
    # Single cast feeding the second MXU pass; accumulate in f32 again.
    y = jnp.dot(h.astype(w2_ref.dtype), w2_ref[...],
                preferred_element_type=jnp.float32) + b2_ref[...]
    o_ref[...] = y.astype(o_ref.dtype)


@functools.partial(jax.jit, static_argnames=("block_b", "compute_dtype", "out_dtype"))
def mlp_forward(x, w1_t, b1, w2_t, b2, *, block_b=None,
                compute_dtype=jnp.float32, out_dtype=None):
    """Fused Linear -> ReLU -> Linear.

    x:           (B, 128), any float dtype (DMA'd natively, cast in-kernel)
    w1_t, w2_t:  (128, 128) PyTorch weights already transposed to (in, out)
    b1, b2:      (128,)
    compute_dtype: MXU dtype.  Default f32 matches PyTorch numerics; pass
                 jnp.bfloat16 for the fast path (small precision loss).
    out_dtype:   output dtype (default: x.dtype).  bf16 halves the write stream.
    """
    B, D = x.shape
    if out_dtype is None:
        out_dtype = x.dtype

    if block_b is None:
        block_b = _pick_block_b(B)
    grid_b = pl.cdiv(B, block_b)   # ragged last block handled by Pallas masking

    # Weights/biases are tiny (64 KiB each) and resident in VMEM; a one-time
    # wrapper cast is negligible (and a no-op for f32 compute).
    w1c = w1_t.astype(compute_dtype)
    w2c = w2_t.astype(compute_dtype)
    b1r = b1.reshape(1, D).astype(jnp.float32)
    b2r = b2.reshape(1, D).astype(jnp.float32)

    x_bytes = jnp.dtype(x.dtype).itemsize
    o_bytes = jnp.dtype(out_dtype).itemsize
    w_bytes = jnp.dtype(compute_dtype).itemsize
    cost = pl.CostEstimate(
        flops=4 * B * D * D,                          # two (B,128)x(128,128) matmuls
        transcendentals=0,
        bytes_accessed=(B * D * x_bytes               # x read (native dtype)
                        + B * D * o_bytes             # y write
                        + 2 * D * D * w_bytes         # resident weights
                        + 2 * D * 4),                 # f32 biases
    )

    out = pl.pallas_call(
        _mlp_kernel,
        out_shape=jax.ShapeDtypeStruct((B, D), out_dtype),
        grid_spec=pltpu.PrefetchScalarGridSpec(
            num_scalar_prefetch=0,
            grid=(grid_b,),
            in_specs=[
                pl.BlockSpec((block_b, D), lambda i: (i, 0)),  # x tile (pipelined)
                pl.BlockSpec((D, D), lambda i: (0, 0)),        # W1^T resident, no re-DMA
                pl.BlockSpec((1, D), lambda i: (0, 0)),        # b1 resident (1,128)
                pl.BlockSpec((D, D), lambda i: (0, 0)),        # W2^T resident, no re-DMA
                pl.BlockSpec((1, D), lambda i: (0, 0)),        # b2 resident (1,128)
            ],
            out_specs=pl.BlockSpec((block_b, D), lambda i: (i, 0)),
        ),
        compiler_params=pltpu.CompilerParams(
            # Batch tiles are independent -> shard across v7x TensorCores.
            # (If profiling shows one TC idle, switch to pltpu.CORE_PARALLEL.)
            dimension_semantics=("parallel",),
            # Headroom for the large tiles; 32 MiB is safe on v5e/v6e/v7x.
            vmem_limit_bytes=32 * 1024 * 1024,
        ),
        cost_estimate=cost,
    )(x, w1c, b1r, w2c, b2r)

    return out


def _reference(x, w1_t, b1, w2_t, b2):
    h = jnp.maximum(x @ w1_t + b1[None, :], 0.0)
    return h @ w2_t + b2[None, :]


if __name__ == "__main__":
    key = jax.random.PRNGKey(0)
    k_x, k_w1, k_b1, k_w2, k_b2 = jax.random.split(key, 5)

    D = 128  # the module fixes in/out features at 128

    # Deterministic PyTorch-Linear-style params: W (out,in) -> transposed to (in,out).
    bound = 1.0 / jnp.sqrt(jnp.float32(D))
    w1 = jax.random.uniform(k_w1, (D, D), jnp.float32, -bound, bound)
    b1 = jax.random.uniform(k_b1, (D,), jnp.float32, -bound, bound)
    w2 = jax.random.uniform(k_w2, (D, D), jnp.float32, -bound, bound)
    b2 = jax.random.uniform(k_b2, (D,), jnp.float32, -bound, bound)
    w1_t, w2_t = w1.T, w2.T

    # 1) Small ragged batch (12 rows -> single 16-row tile, masked last block),
    #    default f32 compute -> tight check vs reference.
    x_small = jax.random.normal(k_x, (12, D), dtype=jnp.float32)
    out_small = jax.block_until_ready(mlp_forward(x_small, w1_t, b1, w2_t, b2))
    ref_small = _reference(x_small, w1_t, b1, w2_t, b2)
    assert out_small.shape == (12, D)
    assert jnp.allclose(out_small, ref_small, atol=1e-4, rtol=1e-4), "f32 path mismatch"

    # 2) Multi-tile grid (512 rows -> 2 x 256-row tiles, both v7x TCs busy) with
    #    opt-in bf16 MXU compute, f32 accumulation; loose check vs f32 reference.
    x = jax.random.normal(k_x, (512, D), dtype=jnp.float32)
    out = jax.block_until_ready(
        mlp_forward(x, w1_t, b1, w2_t, b2, compute_dtype=jnp.bfloat16))
    ref = _reference(x, w1_t, b1, w2_t, b2)
    assert out.shape == (512, D)
    assert jnp.allclose(out, ref, atol=5e-2, rtol=5e-2), "bf16 path mismatch vs f32 ref"

    print("KERNEL_OK")
</pallas_src>

<mosaic_0001>
module attributes {stable_mosaic.version = 11 : i64} {
  func.func @_mlp_kernel(%arg0: i32, %arg1: memref<16x128xf32, #tpu.memory_space<vmem>>, %arg2: memref<128x128xf32, #tpu.memory_space<vmem>>, %arg3: memref<1x128xf32, #tpu.memory_space<vmem>>, %arg4: memref<128x128xf32, #tpu.memory_space<vmem>>, %arg5: memref<1x128xf32, #tpu.memory_space<vmem>>, %arg6: memref<16x128xf32, #tpu.memory_space<vmem>>) attributes {dimension_semantics = [#tpu.dimension_semantics<parallel>], iteration_bounds = array<i64: 1>, scalar_prefetch = 0 : i64, scratch_operands = 0 : i64, tpu.core_type = #tpu.core_type<tc>, window_params = [{transform_indices = @transform_0, window_bounds = array<i64: 16, 128>}, {pipeline_mode = #tpu.pipeline_mode<synchronous>, transform_indices = @transform_1, window_bounds = array<i64: 128, 128>}, {pipeline_mode = #tpu.pipeline_mode<synchronous>, transform_indices = @transform_2, window_bounds = array<i64: 1, 128>}, {pipeline_mode = #tpu.pipeline_mode<synchronous>, transform_indices = @transform_3, window_bounds = array<i64: 128, 128>}, {pipeline_mode = #tpu.pipeline_mode<synchronous>, transform_indices = @transform_4, window_bounds = array<i64: 1, 128>}, {transform_indices = @transform_5, window_bounds = array<i64: 16, 128>}]} {
    %c0 = arith.constant 0 : index
    %c0_0 = arith.constant 0 : index
    %0 = vector.load %arg1[%c0, %c0_0] : memref<16x128xf32, #tpu.memory_space<vmem>>, vector<16x128xf32>
    %c0_1 = arith.constant 0 : index
    %c0_2 = arith.constant 0 : index
    %1 = vector.load %arg2[%c0_1, %c0_2] : memref<128x128xf32, #tpu.memory_space<vmem>>, vector<128x128xf32>
    %cst = arith.constant dense<0.000000e+00> : vector<16x128xf32>
    %2 = tpu.matmul %0, %1, %cst {dimension_numbers = #tpu.dot_dimension_numbers<[1], [0], [0], [1], [0, 0, 1, 1], [], []>} : vector<16x128xf32>, vector<128x128xf32>, vector<16x128xf32> -> vector<16x128xf32>
    %c0_3 = arith.constant 0 : index
    %c0_4 = arith.constant 0 : index
    %3 = vector.load %arg3[%c0_3, %c0_4] : memref<1x128xf32, #tpu.memory_space<vmem>>, vector<1x128xf32>
    %4 = vector.broadcast %3 : vector<1x128xf32> to vector<16x128xf32>
    %5 = arith.addf %2, %4 : vector<16x128xf32>
    %cst_5 = arith.constant 0.000000e+00 : f32
    %6 = vector.broadcast %cst_5 : f32 to vector<16x128xf32>
    %7 = arith.maximumf %5, %6 : vector<16x128xf32>
    %c0_6 = arith.constant 0 : index
    %c0_7 = arith.constant 0 : index
    %8 = vector.load %arg4[%c0_6, %c0_7] : memref<128x128xf32, #tpu.memory_space<vmem>>, vector<128x128xf32>
    %cst_8 = arith.constant dense<0.000000e+00> : vector<16x128xf32>
    %9 = tpu.matmul %7, %8, %cst_8 {dimension_numbers = #tpu.dot_dimension_numbers<[1], [0], [0], [1], [0, 0, 1, 1], [], []>} : vector<16x128xf32>, vector<128x128xf32>, vector<16x128xf32> -> vector<16x128xf32>
    %c0_9 = arith.constant 0 : index
    %c0_10 = arith.constant 0 : index
    %10 = vector.load %arg5[%c0_9, %c0_10] : memref<1x128xf32, #tpu.memory_space<vmem>>, vector<1x128xf32>
    %11 = vector.broadcast %10 : vector<1x128xf32> to vector<16x128xf32>
    %12 = arith.addf %9, %11 : vector<16x128xf32>
    %c0_11 = arith.constant 0 : index
    %c0_12 = arith.constant 0 : index
    %13 = vector.load %arg6[%c0_11, %c0_12] : memref<16x128xf32, #tpu.memory_space<vmem>>, vector<16x128xf32>
    tpu.vector_store %arg6[%c0_11, %c0_12], %12 {strides = array<i32>} : memref<16x128xf32, #tpu.memory_space<vmem>>, vector<16x128xf32>,
    return
  }
  func.func @transform_0(%arg0: i32) -> (i32, i32) {
    %c0_i32 = arith.constant 0 : i32
    %c0_i32_0 = arith.constant 0 : i32
    return %arg0, %c0_i32 : i32, i32
  }
  func.func @transform_1(%arg0: i32) -> (i32, i32) {
    %c0_i32 = arith.constant 0 : i32
    %c0_i32_0 = arith.constant 0 : i32
    %c0_i32_1 = arith.constant 0 : i32
    return %c0_i32, %c0_i32_0 : i32, i32
  }
  func.func @transform_2(%arg0: i32) -> (i32, i32) {
    %c0_i32 = arith.constant 0 : i32
    %c0_i32_0 = arith.constant 0 : i32
    %c0_i32_1 = arith.constant 0 : i32
    return %c0_i32, %c0_i32_0 : i32, i32
  }
  func.func @transform_3(%arg0: i32) -> (i32, i32) {
    %c0_i32 = arith.constant 0 : i32
    %c0_i32_0 = arith.constant 0 : i32
    %c0_i32_1 = arith.constant 0 : i32
    return %c0_i32, %c0_i32_0 : i32, i32
  }
  func.func @transform_4(%arg0: i32) -> (i32, i32) {
    %c0_i32 = arith.constant 0 : i32
    %c0_i32_0 = arith.constant 0 : i32
    %c0_i32_1 = arith.constant 0 : i32
    return %c0_i32, %c0_i32_0 : i32, i32
  }
  func.func @transform_5(%arg0: i32) -> (i32, i32) {
    %c0_i32 = arith.constant 0 : i32
    %c0_i32_0 = arith.constant 0 : i32
    return %arg0, %c0_i32 : i32, i32
  }
}

</mosaic_0001>

<bundles_post_ra>
// kernel: mlp_forward.1
= control target key start
LH: loop header
LB: loop body
LE: loop exit
PB: predicated region body
PF: predicated region fallthrough
CT: control target
= control target key end

     0   :  { %10 = vsyncpa [#allocation3], 0  ;;  %s388_s0 = inlined_call_operand.hbm [shape: f32[12,128], index: 0, kind: input, shape index: {}]   ;;  %s389_s1 = inlined_call_operand.hbm [shape: f32[128,128], index: 1, kind: input, shape index: {}]   ;;  %s390_s2 = inlined_call_operand.vmem [shape: f32[1,128], index: 2, kind: input, shape index: {}]   ;;  %s391_s3 = inlined_call_operand.hbm [shape: f32[128,128], index: 3, kind: input, shape index: {}]   ;;  %s392_s4 = inlined_call_operand.vmem [shape: f32[1,128], index: 4, kind: input, shape index: {}]   ;;  %s393_s5 = inlined_call_operand.hbm [shape: f32[12,128], index: 5, kind: output, shape index: {}]  }
   0x1   :  { %11 = vsyncpa [#allocation6], 0 }
   0x2   :  { %12 = vsyncpa [#allocation4], 0  ;;  %s30_s20 = sshll.u32 %s389_s1, 4  ;;  %s322_s21 = smov [#allocation5]   ;;  %s31_s20 = int_to_ptr.hbm [resolvable:$true] %s30_s20 }
   0x3   :  { %s32_s22 = sshll.u32 %s322_s21, 4  ;;  %s17_s25 = sshll.u32 %s388_s0, 4  ;;  %s33_s22 = int_to_ptr.vmem [resolvable:$true] %s32_s22  ;;  %s18_s25 = int_to_ptr.hbm [resolvable:$true] %s17_s25 }
   0x4   :  { %s323_s26 = smov 128   ;;  %s324_s27 = smov 8  }
   0x5   :  { %38 = dma.hbm_to_vmem [thread:$0]  %s31_s20, 2048, %s33_s22, [#allocation6], %s323_s26, %s323_s26, %s324_s27  }
   0x6   :  { %s325_s28 = smov [#allocation2]   ;;  %s45_s1 = sshll.u32 %s391_s3, 4  ;;  %s46_s1 = int_to_ptr.hbm [resolvable:$true] %s45_s1 }
   0x7   :  { %s19_s29 = sshll.u32 %s325_s28, 4  ;;  %s326_s0 = smov [#allocation7]   ;;  %s20_s29 = int_to_ptr.vmem [resolvable:$true] %s19_s29 }
   0x8   :  { %25 = dma.hbm_to_vmem [thread:$0]  %s18_s25, 256, %s20_s29, [#allocation3], %s323_s26, %s323_s26, %s324_s27  }
   0x9   :  { %s47_s7 = sshll.u32 %s326_s0, 4  ;;  %s48_s7 = int_to_ptr.vmem [resolvable:$true] %s47_s7 }
   0xa   :  { %53 = dma.hbm_to_vmem [thread:$0]  %s46_s1, 2048, %s48_s7, [#allocation6], %s323_s26, %s323_s26, %s324_s27  }
   0xb   :  { %316 = dma.done.wait [#allocation3], 256  }
   0xc   :  { %317 = vsyncadd [#allocation3], 4294967040 }
   0xd   :  { %318 = dma.done.wait [#allocation6], 4096  }
   0xe   :  { %319 = vsyncadd [#allocation6], 4294963200  ;;  %v85_v0 = vld [vmem:[#allocation5 + $0x78] sm:$0xff]  ;;  %v84_v1 = vld [vmem:[#allocation5 + $0x70] sm:$0xff]  ;;  %s327_s11 = smov [#allocation8]  }
   0xf   :  { %180 = vmatpush.msra.mxu2 %v85_v0  ;;  %90 = vmatpush.msra.mxu0 %v85_v0  ;;  %v83_v2 = vld [vmem:[#allocation5 + $0x68] sm:$0xff]  ;;  %v82_v3 = vld [vmem:[#allocation5 + $0x60] sm:$0xff]  ;;  %v81_v4 = vld [vmem:[#allocation5 + $0x58] sm:$0xff]  ;;  %s164_s12 = sshll.u32 %s327_s11, 4  ;;  %s165_s12 = int_to_ptr.vmem [resolvable:$true] %s164_s12 }
  0x10   :  { %v130_v5 = vld [vmem:[#allocation7 + $0x78] sm:$0xff]  ;;  %v129_v6 = vld [vmem:[#allocation7 + $0x70] sm:$0xff]  ;;  %v128_v8 = vld [vmem:[#allocation7 + $0x68] sm:$0xff] }
  0x11   :  { %181 = vmatpush.msra.mxu2 %v84_v1  ;;  %91 = vmatpush.msra.mxu0 %v84_v1  ;;  %v80_v7 = vld [vmem:[#allocation5 + $0x50] sm:$0xff]  ;;  %v79_v9 = vld [vmem:[#allocation5 + $0x48] sm:$0xff]  ;;  %v127_v10 = vld [vmem:[#allocation7 + $0x60] sm:$0xff] }
  0x12   :  { %196 = vmatpush.msra.mxu3 %v130_v5  ;;  %135 = vmatpush.msra.mxu1 %v130_v5  ;;  %v78_v11 = vld [vmem:[#allocation5 + $0x40] sm:$0xff]  ;;  %v126_v12 = vld [vmem:[#allocation7 + $0x58] sm:$0xff]  ;;  %v125_v14 = vld [vmem:[#allocation7 + $0x50] sm:$0xff] }
  0x13   :  { %182 = vmatpush.msra.mxu2 %v83_v2  ;;  %92 = vmatpush.msra.mxu0 %v83_v2  ;;  %v77_v13 = vld [vmem:[#allocation5 + $0x38] sm:$0xff]  ;;  %v76_v15 = vld [vmem:[#allocation5 + $0x30] sm:$0xff]  ;;  %v124_v16 = vld [vmem:[#allocation7 + $0x48] sm:$0xff] }
  0x14   :  { %197 = vmatpush.msra.mxu3 %v129_v6  ;;  %136 = vmatpush.msra.mxu1 %v129_v6  ;;  %v75_v17 = vld [vmem:[#allocation5 + $0x28] sm:$0xff]  ;;  %v123_v18 = vld [vmem:[#allocation7 + $0x40] sm:$0xff]  ;;  %v122_v20 = vld [vmem:[#allocation7 + $0x38] sm:$0xff] }
  0x15   :  { %183 = vmatpush.msra.mxu2 %v82_v3  ;;  %93 = vmatpush.msra.mxu0 %v82_v3  ;;  %v74_v19 = vld [vmem:[#allocation5 + $0x20] sm:$0xff]  ;;  %v73_v21 = vld [vmem:[#allocation5 + $0x18] sm:$0xff]  ;;  %v121_v22 = vld [vmem:[#allocation7 + $0x30] sm:$0xff] }
  0x16   :  { %198 = vmatpush.msra.mxu3 %v128_v8  ;;  %137 = vmatpush.msra.mxu1 %v128_v8  ;;  %v72_v23 = vld [vmem:[#allocation5 + $0x10] sm:$0xff]  ;;  %v120_v24 = vld [vmem:[#allocation7 + $0x28] sm:$0xff]  ;;  %v119_v26 = vld [vmem:[#allocation7 + $0x20] sm:$0xff] }
  0x17   :  { %184 = vmatpush.msra.mxu2 %v81_v4  ;;  %94 = vmatpush.msra.mxu0 %v81_v4  ;;  %v71_v25 = vld [vmem:[#allocation5 + $0x8] sm:$0xff]  ;;  %v70_v27 = vld [vmem:[#allocation5] sm:$0xff]  ;;  %v69_v28 = vld [vmem:[#allocation2 + $0x8] sm:$0xff] }
  0x18   :  { %199 = vmatpush.msra.mxu3 %v127_v10  ;;  %138 = vmatpush.msra.mxu1 %v127_v10  ;;  %v68_v29 = vld [vmem:[#allocation2] sm:$0xff]  ;;  %v118_v30 = vld [vmem:[#allocation7 + $0x18] sm:$0xff]  ;;  %v116_v32 = vld [vmem:[#allocation7 + $0x8] sm:$0xff] }
  0x19   :  { %185 = vmatpush.msra.mxu2 %v80_v7  ;;  %95 = vmatpush.msra.mxu0 %v80_v7  ;;  %v117_v31 = vld [vmem:[#allocation7 + $0x10] sm:$0xff]  ;;  %v115_v33 = vld [vmem:[#allocation7] sm:$0xff] }
  0x1a   :  { %200 = vmatpush.msra.mxu3 %v126_v12  ;;  %139 = vmatpush.msra.mxu1 %v126_v12  ;;  %v218_v34 = vld [vmem:[%s390_s2] ss:$0 sm:$0xff]  ;;  %s166_s2 = sshll.u32 %s393_s5, 4  ;;  %s167_s2 = int_to_ptr.hbm [resolvable:$true] %s166_s2 }
  0x1b   :  { %186 = vmatpush.msra.mxu2 %v79_v9  ;;  %96 = vmatpush.msra.mxu0 %v79_v9  ;;  %v219_v41 = vld [vmem:[%s392_s4] ss:$0 sm:$0xff] }
  0x1c   :  { %201 = vmatpush.msra.mxu3 %v125_v14  ;;  %140 = vmatpush.msra.mxu1 %v125_v14 }
  0x1d   :  { %187 = vmatpush.msra.mxu2 %v78_v11  ;;  %97 = vmatpush.msra.mxu0 %v78_v11 }
  0x1e   :  { %202 = vmatpush.msra.mxu3 %v124_v16  ;;  %141 = vmatpush.msra.mxu1 %v124_v16 }
  0x1f   :  { %188 = vmatpush.msra.mxu2 %v77_v13  ;;  %98 = vmatpush.msra.mxu0 %v77_v13 }
  0x20   :  { %203 = vmatpush.msra.mxu3 %v123_v18  ;;  %142 = vmatpush.msra.mxu1 %v123_v18 }
  0x21   :  { %189 = vmatpush.msra.mxu2 %v76_v15  ;;  %99 = vmatpush.msra.mxu0 %v76_v15 }
  0x22   :  { %204 = vmatpush.msra.mxu3 %v122_v20  ;;  %143 = vmatpush.msra.mxu1 %v122_v20 }
  0x23   :  { %190 = vmatpush.msra.mxu2 %v75_v17  ;;  %100 = vmatpush.msra.mxu0 %v75_v17 }
  0x24   :  { %205 = vmatpush.msra.mxu3 %v121_v22  ;;  %144 = vmatpush.msra.mxu1 %v121_v22 }
  0x25   :  { %191 = vmatpush.msra.mxu2 %v74_v19  ;;  %101 = vmatpush.msra.mxu0 %v74_v19 }
  0x26   :  { %206 = vmatpush.msra.mxu3 %v120_v24  ;;  %145 = vmatpush.msra.mxu1 %v120_v24 }
  0x27   :  { %192 = vmatpush.msra.mxu2 %v73_v21  ;;  %102 = vmatpush.msra.mxu0 %v73_v21 }
  0x28   :  { %207 = vmatpush.msra.mxu3 %v119_v26  ;;  %146 = vmatpush.msra.mxu1 %v119_v26 }
  0x29   :  { %193 = vmatpush.msra.mxu2 %v72_v23  ;;  %103 = vmatpush.msra.mxu0 %v72_v23 }
  0x2a   :  { %208 = vmatpush.msra.mxu3 %v118_v30  ;;  %147 = vmatpush.msra.mxu1 %v118_v30 }
  0x2b   :  { %194 = vmatpush.msra.mxu2 %v71_v25  ;;  %104 = vmatpush.msra.mxu0 %v71_v25 }
  0x2c   :  { %209 = vmatpush.msra.mxu3 %v117_v31  ;;  %148 = vmatpush.msra.mxu1 %v117_v31 }
  0x2d   :  { %195 = vmatpush.msra.mxu2 %v70_v27  ;;  %105 = vmatpush.msra.mxu0 %v70_v27 }
  0x2e   :  { %109 = vmatmul.f32.vlgmr.msra.gmra.mxu2 %v69_v28  ;;  %106 = vmatmul.f32.vlgmr.msra.gmra.mxu0 %v68_v29 }
  0x2f   :  { %210 = vmatpush.msra.mxu3 %v116_v32  ;;  %149 = vmatpush.msra.mxu1 %v116_v32 }
  0x31   :  { %211 = vmatpush.msra.mxu3 %v115_v33  ;;  %150 = vmatpush.msra.mxu1 %v115_v33 }
  0xab   :  { %v107_v35 = vpop.f32.mrf.mxu0 }
  0xac   :  { %v108_v36 = vadd.f32 %v218_v34, %v107_v35 }
  0xae   :  { %v113_v37 = vmax.f32 %v108_v36, 0.0 }
  0xb0   :  { %151 = vmatmul.f32.vlgmr.msra.gmra.mxu1 %v113_v37 }
  0xb1   :  { %v110_v38 = vpop.f32.mrf.mxu2 }
  0xb2   :  { %v111_v39 = vadd.f32 %v218_v34, %v110_v38 }
  0xb4   :  { %v114_v40 = vmax.f32 %v111_v39, 0.0 }
  0xb6   :  { %154 = vmatmul.f32.vlgmr.msra.gmra.mxu3 %v114_v40 }
 0x12d   :  { %v152_v42 = vpop.f32.mrf.mxu1 }
 0x12e   :  { %v153_v43 = vadd.f32 %v219_v41, %v152_v42 }
 0x130   :  { %158 = vst [vmem:[#allocation8] sm:$0xff] %v153_v43 }
 0x139   :  { %v155_v44 = vpop.f32.mrf.mxu3 }
 0x13a   :  { %v156_v45 = vadd.f32 %v219_v41, %v155_v44 }
 0x13c   :  { %159 = vst [vmem:[#allocation8 + $0x8] sm:$0xff] %v156_v45 }
 0x13d   :  { %172 = dma.vmem_to_hbm [thread:$0]  %s165_s12, 256, %s167_s2, [#allocation4], %s323_s26, %s323_s26, %s324_s27  }
 0x13e   :  { %320 = dma.done.wait [#allocation4], 256  }
 0x13f   :  { %321 = vsyncadd [#allocation4], 4294967040 }
 0x140   :  { %177 = vsyncpa [#allocation3], 1 }
 0x141   :  { %178 = vsyncpa [#allocation6], 1 }
 0x142   :  { %179 = vsyncpa [#allocation4], 1 }

</bundles_post_ra>
